<compile_context>
chip_gen: v6e
topology: v6e:2x2x1
jax: 0.10.0
libtpu: 0.0.40
codegen_flags: <defaults>
</compile_context>

<pallas_src>
import functools

import jax
import jax.numpy as jnp
from jax import lax
from jax.experimental import pallas as pl
from jax.experimental.pallas import tpu as pltpu

_LANE = 128


def _cdiv(a, b):
    return -(-a // b)


def _round_up(v, m):
    return ((v + m - 1) // m) * m


def _tpu_config():
    """(num_tensorcores_to_use, bytes_per_input_block)."""
    try:
        kind = jax.devices()[0].device_kind.lower()
    except Exception:  # pragma: no cover - defensive
        kind = ""
    is_v7 = ("v7" in kind) or ("tpu7" in kind)
    if is_v7 or ("v6" in kind):
        block_bytes = 4 * 1024 * 1024   # 16 MiB double-buffered: fits 32 MiB default scoped VMEM
    else:
        block_bytes = 2 * 1024 * 1024   # 8 MiB double-buffered: fits v5e's 16 MiB default
    ncores = 2 if is_v7 else 1          # only v7x has 2 TensorCores per chip
    return ncores, block_bytes


def _rmse_partial_kernel(x_ref, y_ref, part_ref, *, block_rows, rows,
                         blocks_per_core, acc_rows, need_mask,
                         first_tail_blk, ncores):
    if ncores == 1:
        i = pl.program_id(0)
        blk = i
    else:
        c = pl.program_id(0)
        i = pl.program_id(1)
        blk = c * blocks_per_core + i

    @pl.when(i == 0)
    def _():
        part_ref[...] = jnp.zeros_like(part_ref)

    d = x_ref[...].astype(jnp.float32) - y_ref[...].astype(jnp.float32)
    sq = d * d

    def _accum(vals):
        # (block_rows,128) -> (block_rows//acc_rows, acc_rows, 128): elementwise
        # VPU adds into the resident (acc_rows,128) accumulator; acc_rows=64
        # keeps the dependent chain short (ILP insurance for big/bf16 blocks).
        part_ref[...] += vals.reshape(block_rows // acc_rows, acc_rows,
                                      _LANE).sum(axis=0)

    if not need_mask:
        # Compile-time aligned path: every block is fully covered by real data.
        _accum(sq)
    else:
        is_interior = blk < first_tail_blk

        @pl.when(is_interior)
        def _():
            _accum(sq)

        @pl.when(jnp.logical_not(is_interior))
        def _():
            # Tail / clamped-duplicate blocks only: zero rows past `rows`
            # (select-based, so garbage NaN/Inf in over-read rows cannot leak).
            row_ids = blk * block_rows + lax.broadcasted_iota(
                jnp.int32, (block_rows, _LANE), 0)
            _accum(jnp.where(row_ids < rows, sq, jnp.float32(0.0)))


def _partial_sums(x2, y2, rows, ncores, block_bytes):
    itemsize = jnp.dtype(x2.dtype).itemsize
    acc_rows = 64 if rows >= 64 * ncores else 8
    # Block-row granularity: accumulator rows AND the dtype's minimum sublane
    # tiling (8 for 32-bit, 16 for 16-bit, 32 for 8-bit).
    grain = max(acc_rows, 32 // itemsize)
    cap_rows = max(grain, (block_bytes // (_LANE * itemsize)) // grain * grain)

    # Balanced split: give each core ~rows/ncores rows, then size blocks so a
    # core's work is bpc equal blocks (block_rows <= cap_rows by construction).
    rows_per_core = _cdiv(rows, ncores)
    blocks_per_core = _cdiv(rows_per_core, cap_rows)
    block_rows = min(cap_rows,
                     _round_up(_cdiv(rows_per_core, blocks_per_core), grain))

    need_mask = (ncores * blocks_per_core * block_rows != rows)
    last_blk = _cdiv(rows, block_rows) - 1       # last block index inside the array
    first_tail_blk = rows // block_rows          # first block needing masking

    kern = functools.partial(
        _rmse_partial_kernel, block_rows=block_rows, rows=rows,
        blocks_per_core=blocks_per_core, acc_rows=acc_rows,
        need_mask=need_mask, first_tail_blk=first_tail_blk, ncores=ncores)

    if ncores == 1:
        grid = (blocks_per_core,)
        in_map = lambda i: (jnp.minimum(i, last_blk), 0)
        out_map = lambda i: (0, 0)
        sem = (pltpu.ARBITRARY,)
    else:
        grid = (ncores, blocks_per_core)
        in_map = lambda c, i: (jnp.minimum(c * blocks_per_core + i, last_blk), 0)
        out_map = lambda c, i: (c, 0)
        sem = (pltpu.CORE_PARALLEL, pltpu.ARBITRARY)

    return pl.pallas_call(
        kern,
        out_shape=jax.ShapeDtypeStruct((ncores * acc_rows, _LANE), jnp.float32),
        grid_spec=pltpu.PrefetchScalarGridSpec(
            num_scalar_prefetch=0,
            grid=grid,
            in_specs=[pl.BlockSpec((block_rows, _LANE), in_map),
                      pl.BlockSpec((block_rows, _LANE), in_map)],
            out_specs=pl.BlockSpec((acc_rows, _LANE), out_map),
        ),
        compiler_params=pltpu.CompilerParams(dimension_semantics=sem),
    )(x2, y2)


def rmse_loss(x, y, eps=1e-6):
    """sqrt(mean((x - y)^2) + eps), matching torch.sqrt(MSELoss()(x, y) + eps)."""
    assert x.shape == y.shape, "x and y must have the same shape"
    n = x.size
    xf = x.reshape(-1)
    yf = y.reshape(-1)

    pad = (-n) % _LANE
    if pad:
        # Rare path (n not a multiple of 128): identical zero-pad so the flat
        # view reshapes to (rows, 128); padded elements have diff == 0.
        xf = jnp.concatenate([xf, jnp.zeros((pad,), xf.dtype)])
        yf = jnp.concatenate([yf, jnp.zeros((pad,), yf.dtype)])

    rows = (n + pad) // _LANE
    x2 = xf.reshape(rows, _LANE)
    y2 = yf.reshape(rows, _LANE)

    ncores, block_bytes = _tpu_config()
    if ncores > 1:
        try:
            partials = _partial_sums(x2, y2, rows, ncores, block_bytes)
        except Exception:
            # Fallback: single-core config (always lowers).
            partials = _partial_sums(x2, y2, rows, 1, block_bytes)
    else:
        partials = _partial_sums(x2, y2, rows, 1, block_bytes)

    # Final tree-reduce over the tiny per-lane partials + mean + sqrt(+eps).
    return jnp.sqrt(jnp.sum(partials) / jnp.float32(n) + jnp.float32(eps))


if __name__ == "__main__":
    key = jax.random.PRNGKey(0)
    kx, ky = jax.random.split(key)

    # NCHW-shaped example inputs (matches typical use of this loss module).
    x = jax.random.normal(kx, (2, 4, 16, 16), dtype=jnp.float32)
    y = jax.random.normal(ky, (2, 4, 16, 16), dtype=jnp.float32)
    loss = jax.block_until_ready(rmse_loss(x, y))
    ref = jnp.sqrt(jnp.mean((x - y) ** 2) + 1e-6)
    assert jnp.allclose(loss, ref, rtol=1e-5, atol=1e-6), (loss, ref)

    # Unaligned-size check (exercises the masked tail path: n % 128 != 0).
    xu = jax.random.normal(kx, (3, 5, 7), dtype=jnp.float32)
    yu = jax.random.normal(ky, (3, 5, 7), dtype=jnp.float32)
    loss_u = jax.block_until_ready(rmse_loss(xu, yu))
    ref_u = jnp.sqrt(jnp.mean((xu - yu) ** 2) + 1e-6)
    assert jnp.allclose(loss_u, ref_u, rtol=1e-5, atol=1e-6), (loss_u, ref_u)

    print("KERNEL_OK")
</pallas_src>

<mosaic_0001>
module attributes {stable_mosaic.version = 11 : i64} {
  func.func @_rmse_partial_kernel(%arg0: i32, %arg1: memref<16x128xf32, #tpu.memory_space<vmem>>, %arg2: memref<16x128xf32, #tpu.memory_space<vmem>>, %arg3: memref<8x128xf32, #tpu.memory_space<vmem>>) attributes {dimension_semantics = [#tpu.dimension_semantics<arbitrary>], iteration_bounds = array<i64: 1>, scalar_prefetch = 0 : i64, scratch_operands = 0 : i64, tpu.core_type = #tpu.core_type<tc>, window_params = [{transform_indices = @transform_0, window_bounds = array<i64: 16, 128>}, {transform_indices = @transform_1, window_bounds = array<i64: 16, 128>}, {pipeline_mode = #tpu.pipeline_mode<synchronous>, transform_indices = @transform_2, window_bounds = array<i64: 8, 128>}]} {
    %c0_i32 = arith.constant 0 : i32
    %0 = arith.cmpi eq, %arg0, %c0_i32 : i32
    %1 = arith.extui %0 : i1 to i32
    %c0_i32_0 = arith.constant 0 : i32
    %2 = arith.cmpi ne, %1, %c0_i32_0 : i32
    scf.if %2 {
      %cst_8 = arith.constant 0.000000e+00 : f32
      %12 = vector.broadcast %cst_8 : f32 to vector<8x128xf32>
      %c0_9 = arith.constant 0 : index
      %c0_10 = arith.constant 0 : index
      %13 = vector.load %arg3[%c0_9, %c0_10] : memref<8x128xf32, #tpu.memory_space<vmem>>, vector<8x128xf32>
      tpu.vector_store %arg3[%c0_9, %c0_10], %12 {strides = array<i32>} : memref<8x128xf32, #tpu.memory_space<vmem>>, vector<8x128xf32>,
    } else {
    }
    %c0 = arith.constant 0 : index
    %c0_1 = arith.constant 0 : index
    %3 = vector.load %arg1[%c0, %c0_1] : memref<16x128xf32, #tpu.memory_space<vmem>>, vector<16x128xf32>
    %c0_2 = arith.constant 0 : index
    %c0_3 = arith.constant 0 : index
    %4 = vector.load %arg2[%c0_2, %c0_3] : memref<16x128xf32, #tpu.memory_space<vmem>>, vector<16x128xf32>
    %5 = arith.subf %3, %4 : vector<16x128xf32>
    %6 = arith.mulf %5, %5 : vector<16x128xf32>
    %c0_4 = arith.constant 0 : index
    %c0_5 = arith.constant 0 : index
    %7 = vector.load %arg3[%c0_4, %c0_5] : memref<8x128xf32, #tpu.memory_space<vmem>>, vector<8x128xf32>
    %8 = vector.shape_cast %6 : vector<16x128xf32> to vector<2x8x128xf32>
    %cst = arith.constant dense<0.000000e+00> : vector<8x128xf32>
    %9 = vector.multi_reduction <add>, %8, %cst [0] : vector<2x8x128xf32> to vector<8x128xf32>
    %10 = arith.addf %7, %9 : vector<8x128xf32>
    %c0_6 = arith.constant 0 : index
    %c0_7 = arith.constant 0 : index
    %11 = vector.load %arg3[%c0_6, %c0_7] : memref<8x128xf32, #tpu.memory_space<vmem>>, vector<8x128xf32>
    tpu.vector_store %arg3[%c0_6, %c0_7], %10 {strides = array<i32>} : memref<8x128xf32, #tpu.memory_space<vmem>>, vector<8x128xf32>,
    return
  }
  func.func @transform_0(%arg0: i32) -> (i32, i32) {
    %c0_i32 = arith.constant 0 : i32
    %0 = arith.minsi %arg0, %c0_i32 : i32
    %c0_i32_0 = arith.constant 0 : i32
    %c0_i32_1 = arith.constant 0 : i32
    return %0, %c0_i32_0 : i32, i32
  }
  func.func @transform_1(%arg0: i32) -> (i32, i32) {
    %c0_i32 = arith.constant 0 : i32
    %0 = arith.minsi %arg0, %c0_i32 : i32
    %c0_i32_0 = arith.constant 0 : i32
    %c0_i32_1 = arith.constant 0 : i32
    return %0, %c0_i32_0 : i32, i32
  }
  func.func @transform_2(%arg0: i32) -> (i32, i32) {
    %c0_i32 = arith.constant 0 : i32
    %c0_i32_0 = arith.constant 0 : i32
    %c0_i32_1 = arith.constant 0 : i32
    return %c0_i32, %c0_i32_0 : i32, i32
  }
}

</mosaic_0001>

<bundles_post_ra>
// kernel: tpu_custom_call.1
= control target key start
LH: loop header
LB: loop body
LE: loop exit
PB: predicated region body
PF: predicated region fallthrough
CT: control target
= control target key end

     0   :  { %7 = vsyncpa [#allocation3], 0  ;;  %s174_s0 = inlined_call_operand.hbm [shape: f32[16,128], index: 0, kind: input, shape index: {}]   ;;  %s175_s1 = inlined_call_operand.hbm [shape: f32[16,128], index: 1, kind: input, shape index: {}]   ;;  %s176_s2 = inlined_call_operand.hbm [shape: f32[8,128], index: 2, kind: output, shape index: {}]  }
   0x1   :  { %8 = vsyncpa [#allocation6], 0 }
   0x2   :  { %9 = vsyncpa [#allocation4], 0  ;;  %s145_s9 = smov [#allocation2]  }
   0x3   :  { %s15_s10 = sshll.u32 %s145_s9, 4  ;;  %s16_s10 = int_to_ptr.vmem [resolvable:$true] %s15_s10 }
   0x4   :  { %s87_s11 = scalar_lea.vmem %s16_s10, 256  ;;  %p92_p1 = scmp.lt.s32.totalorder %s16_s10, %s16_s10 }
   0x5   :  { %p88_p0 = scmp.ne.s32.totalorder %s16_s10, %s87_s11  ;;  %p93_p2 = scmp.lt.s32.totalorder %s87_s11, %s87_s11 }
   0x7   :  { %p94_p3 = por %p93_p2, %p92_p1 }
   0x9   :  { %p95_p4 = pnand %p94_p3, %p88_p0 }
   0xb   :  { %98 = shalt.err (!%p95_p4)
}
   0xc   :  { %s146_s12 = smov 128   ;;  %s147_s13 = smov 8  }
   0xd   :  { %21 = dma.hbm_to_vmem [thread:$0]  %s174_s0, 256, %s16_s10, [#allocation3], %s146_s12, %s146_s12, %s147_s13  }
   0xe   :  { %s148_s16 = smov [#allocation5]  }
   0xf   :  { %s27_s17 = sshll.u32 %s148_s16, 4  ;;  %s28_s17 = int_to_ptr.vmem [resolvable:$true] %s27_s17 }
  0x10   :  { %s107_s18 = scalar_lea.vmem %s28_s17, 256  ;;  %p112_p6 = scmp.lt.s32.totalorder %s28_s17, %s28_s17 }
  0x11   :  { %p108_p5 = scmp.ne.s32.totalorder %s28_s17, %s107_s18  ;;  %p113_p7 = scmp.lt.s32.totalorder %s107_s18, %s107_s18 }
  0x13   :  { %p114_p8 = por %p113_p7, %p112_p6 }
  0x15   :  { %p115_p9 = pnand %p114_p8, %p108_p5 }
  0x17   :  { %118 = shalt.err (!%p115_p9)
}
  0x18   :  { %33 = dma.hbm_to_vmem [thread:$0]  %s175_s1, 256, %s28_s17, [#allocation6], %s146_s12, %s146_s12, %s147_s13  }
  0x19   :  { %139 = dma.done.wait [#allocation3], 256  }
  0x1a   :  { %140 = vsyncadd [#allocation3], 4294967040 }
  0x1b   :  { %141 = dma.done.wait [#allocation6], 256  }
  0x1c   :  { %142 = vsyncadd [#allocation6], 4294967040  ;;  %v45_v0 = vld [vmem:[#allocation2] sm:$0xff]  ;;  %v46_v1 = vld [vmem:[#allocation2 + $0x8] sm:$0xff]  ;;  %s149_s0 = smov [#allocation7]  }
  0x1d   :  { %v47_v2 = vld [vmem:[#allocation5] sm:$0xff]  ;;  %v48_v3 = vld [vmem:[#allocation5 + $0x8] sm:$0xff]  ;;  %s63_s21 = sshll.u32 %s149_s0, 4  ;;  %s64_s21 = int_to_ptr.vmem [resolvable:$true] %s63_s21 }
  0x1e   :  { %v49_v4 = vsub.f32 %v45_v0, %v47_v2  ;;  %v50_v5 = vsub.f32 %v46_v1, %v48_v3  ;;  %s119_s22 = scalar_lea.vmem %s64_s21, 128  ;;  %p124_p11 = scmp.lt.s32.totalorder %s64_s21, %s64_s21 }
  0x1f   :  { %p120_p10 = scmp.ne.s32.totalorder %s64_s21, %s119_s22  ;;  %p125_p12 = scmp.lt.s32.totalorder %s119_s22, %s119_s22 }
  0x20   :  { %v51_v6 = vmul.f32 %v49_v4, %v49_v4  ;;  %v52_v7 = vmul.f32 %v50_v5, %v50_v5 }
  0x21   :  { %p126_p13 = por %p125_p12, %p124_p11 }
  0x22   :  { %v54_v8 = vadd.f32 %v52_v7, %v51_v6 }
  0x23   :  { %p127_p0 = pnand %p126_p13, %p120_p10 }
  0x24   :  { %56 = vst [vmem:[#allocation7] sm:$0xff] %v54_v8 }
  0x25   :  { %130 = shalt.err (!%p127_p0)
}
  0x26   :  { %66 = dma.vmem_to_hbm [thread:$0]  %s64_s21, 128, %s176_s2, [#allocation4]  }
  0x27   :  { %143 = dma.done.wait [#allocation4], 128  }
  0x28   :  { %144 = vsyncadd [#allocation4], 4294967168 }
  0x29   :  { %70 = vsyncpa [#allocation3], 1 }
  0x2a   :  { %71 = vsyncpa [#allocation6], 1 }
  0x2b   :  { %72 = vsyncpa [#allocation4], 1 }

</bundles_post_ra>
